<compile_context>
chip_gen: v7x
topology: tpu7x:2x2x1
jax: 0.10.0
libtpu: 0.0.40
codegen_flags: <defaults>
</compile_context>

<pallas_src>
import functools

import jax
import jax.numpy as jnp
from jax.experimental import pallas as pl
from jax.experimental.pallas import tpu as pltpu


def _layernorm_kernel(x_ref, gamma_ref, beta_ref, out_ref, *, true_n, padded):
    # x_ref: (TB, N_pad) tile; gamma/beta: (1, N_pad) resident blocks.
    x = x_ref[...].astype(jnp.float32)                       # (TB, N_pad)
    gamma = gamma_ref[...].astype(jnp.float32)                # (1, N_pad)
    beta = beta_ref[...].astype(jnp.float32)                  # (1, N_pad)

    inv_n = jnp.float32(1.0 / true_n)

    # Mean over the true feature width (padded lanes hold zeros, so the sum is exact).
    mu = jnp.sum(x, axis=1, keepdims=True) * inv_n            # (TB, 1)
    xc = x - mu                                               # (TB, N_pad)

    if padded:
        # Mask padded lanes out of the variance (they would contribute mu^2 otherwise).
        lane = jax.lax.broadcasted_iota(jnp.int32, x.shape, 1)
        xc_stat = jnp.where(lane < true_n, xc, 0.0)
    else:
        xc_stat = xc

    # Two-pass biased variance — matches the PyTorch reference exactly.
    sigma = jnp.sum(xc_stat * xc_stat, axis=1, keepdims=True) * inv_n

    # Reference adds 0.1 (not eps) before the sqrt — reproduce exactly.
    inv_std = jax.lax.rsqrt(sigma + jnp.float32(0.1))         # EUP rsqrt
    out = gamma * (xc * inv_std) + beta                       # (TB, N_pad)
    out_ref[...] = out.astype(out_ref.dtype)


def _tpu_vmem_bytes():
    try:
        return int(pltpu.get_tpu_info().vmem_capacity_bytes)
    except Exception:
        return 64 << 20   # conservative default == v7x per-TC VMEM


def _choose_block_rows(n_batch, n_pad, itemsize, vmem_bytes, sub):
    """Biggest batch tile (multiple of `sub`) whose working set fits the per-generation
    VMEM budget; large arrays are forced onto >=2 (preferably even) grid steps."""
    # Generation-aware working-set target.
    if vmem_bytes >= (100 << 20):      # v5e / v6e: 128 MiB physical VMEM
        target = 40 << 20
    else:                              # v7x: 64 MiB per TensorCore
        target = 16 << 20

    # Per-row bytes: double-buffered in + out tiles (x.dtype) plus ~4 f32 temporaries
    # materialized by the body (f32 cast, centered, masked, scaled/out).
    per_row = (2 * 2 * itemsize + 4 * 4) * n_pad
    tb = max(sub, (target // per_row) // sub * sub)

    array_bytes = n_batch * n_pad * itemsize
    if tb >= n_batch:
        if array_bytes <= (4 << 20):
            return n_batch             # tiny array: a single full block is cheapest
        # Large array: force >=2 grid steps so DMA pipelines and both v7x TCs get work.
        half = (n_batch + 1) // 2
        tb = max(sub, ((half + sub - 1) // sub) * sub)
        if tb >= n_batch:
            return n_batch

    # Prefer an even number of grid steps (balances v7x's two TensorCores).
    def steps(t):
        return -(-n_batch // t)

    if steps(tb) > 1 and steps(tb) % 2 == 1:
        t = tb
        while t > sub and steps(t) % 2 == 1:
            t -= sub
        if steps(t) % 2 == 0:
            tb = t
    return tb


def custom_layer_norm(x, gamma, beta, block_rows=None):
    """x: (n_batch, n_neurons); gamma, beta: (1, n_neurons)."""
    if x.ndim != 2:
        raise Exception('shape of input should be (n_batch, n_neurons)')
    n_batch, n_neurons = x.shape
    gamma = jnp.asarray(gamma).reshape(1, n_neurons)
    beta = jnp.asarray(beta).reshape(1, n_neurons)

    # Lane-dense feature axis: zero-pad to the next multiple of 128 so stores are
    # unmasked vst; the kernel corrects the statistics with the true width.
    n_pad = ((n_neurons + 127) // 128) * 128
    padded = n_pad != n_neurons
    if padded:
        x_p = jnp.pad(x, ((0, 0), (0, n_pad - n_neurons)))
        gamma_p = jnp.pad(gamma, ((0, 0), (0, n_pad - n_neurons)))
        beta_p = jnp.pad(beta, ((0, 0), (0, n_pad - n_neurons)))
    else:
        x_p, gamma_p, beta_p = x, gamma, beta

    itemsize = jnp.dtype(x.dtype).itemsize
    sub = {1: 32, 2: 16}.get(itemsize, 8)      # min sublane multiple per dtype
    vmem_bytes = _tpu_vmem_bytes()

    if block_rows is None:
        tb = _choose_block_rows(n_batch, n_pad, itemsize, vmem_bytes, sub)
    else:
        tb = block_rows
    if tb >= n_batch:
        tb = n_batch                           # single full-dim block is always legal
    else:
        tb = max(sub, (tb // sub) * sub)       # sublane dim must be a dtype-legal multiple

    grid = (pl.cdiv(n_batch, tb),)             # rows independent -> padded tail rows harmless

    # VMEM budget: double-buffered in/out tiles + f32 temporaries, with headroom,
    # capped per generation (128 MiB chips get a higher cap than v7x's 64 MiB/TC).
    tile_io = tb * n_pad * itemsize
    tile_f32 = tb * n_pad * 4
    needed = 4 * tile_io + 5 * tile_f32 + (2 << 20)
    cap = (64 << 20) if vmem_bytes >= (100 << 20) else (44 << 20)
    vmem_limit = int(min(max(needed, 16 << 20), cap))

    kernel = functools.partial(_layernorm_kernel, true_n=n_neurons, padded=padded)

    out = pl.pallas_call(
        kernel,
        out_shape=jax.ShapeDtypeStruct((n_batch, n_pad), x.dtype),
        grid_spec=pltpu.PrefetchScalarGridSpec(
            num_scalar_prefetch=0,
            grid=grid,
            in_specs=[
                pl.BlockSpec((tb, n_pad), lambda i: (i, 0)),   # x: tiled over batch
                pl.BlockSpec((1, n_pad), lambda i: (0, 0)),    # gamma: resident
                pl.BlockSpec((1, n_pad), lambda i: (0, 0)),    # beta: resident
            ],
            out_specs=pl.BlockSpec((tb, n_pad), lambda i: (i, 0)),
        ),
        compiler_params=pltpu.CompilerParams(
            dimension_semantics=("parallel",),   # rows independent -> shard across TCs (v7x)
            vmem_limit_bytes=vmem_limit,
        ),
    )(x_p, gamma_p, beta_p)

    if padded:
        out = out[:, :n_neurons]
    return out


if __name__ == "__main__":
    key = jax.random.PRNGKey(0)
    k1, k2 = jax.random.split(key)

    def ref_layernorm(x, gamma, beta):
        mu = jnp.mean(x, axis=1, keepdims=True)
        sigma = jnp.mean((x - mu) ** 2, axis=1, keepdims=True)
        return gamma * ((x - mu) / jnp.sqrt(sigma + 0.1)) + beta

    # Case 1: lane-dense features; block_rows=64 forces a 4-step grid (pipelined path).
    n_batch, n_neurons = 256, 128
    x = jax.random.normal(k1, (n_batch, n_neurons), dtype=jnp.float32)
    gamma = jnp.ones((1, n_neurons), dtype=jnp.float32)   # deterministic init, as in __init__
    beta = jnp.zeros((1, n_neurons), dtype=jnp.float32)

    out = custom_layer_norm(x, gamma, beta, block_rows=64)
    jax.block_until_ready(out)
    assert jnp.allclose(out, ref_layernorm(x, gamma, beta), atol=1e-5, rtol=1e-5)

    out_auto = custom_layer_norm(x, gamma, beta)           # auto-tiled path
    jax.block_until_ready(out_auto)
    assert jnp.allclose(out_auto, ref_layernorm(x, gamma, beta), atol=1e-5, rtol=1e-5)

    # Case 2: non-128-multiple feature width (exercises padding + masked statistics).
    n_batch2, n_neurons2 = 64, 100
    x2 = jax.random.normal(k2, (n_batch2, n_neurons2), dtype=jnp.float32)
    gamma2 = jnp.ones((1, n_neurons2), dtype=jnp.float32)
    beta2 = jnp.zeros((1, n_neurons2), dtype=jnp.float32)
    out2 = custom_layer_norm(x2, gamma2, beta2)
    jax.block_until_ready(out2)
    assert jnp.allclose(out2, ref_layernorm(x2, gamma2, beta2), atol=1e-5, rtol=1e-5)

    print("KERNEL_OK")
</pallas_src>

<mosaic_0001>
module attributes {stable_mosaic.version = 11 : i64} {
  func.func @_layernorm_kernel(%arg0: i32, %arg1: memref<64x128xf32, #tpu.memory_space<vmem>>, %arg2: memref<1x128xf32, #tpu.memory_space<vmem>>, %arg3: memref<1x128xf32, #tpu.memory_space<vmem>>, %arg4: memref<64x128xf32, #tpu.memory_space<vmem>>) attributes {dimension_semantics = [#tpu.dimension_semantics<parallel>], iteration_bounds = array<i64: 4>, scalar_prefetch = 0 : i64, scratch_operands = 0 : i64, tpu.core_type = #tpu.core_type<tc>, window_params = [{transform_indices = @transform_0, window_bounds = array<i64: 64, 128>}, {pipeline_mode = #tpu.pipeline_mode<synchronous>, transform_indices = @transform_1, window_bounds = array<i64: 1, 128>}, {pipeline_mode = #tpu.pipeline_mode<synchronous>, transform_indices = @transform_2, window_bounds = array<i64: 1, 128>}, {transform_indices = @transform_3, window_bounds = array<i64: 64, 128>}]} {
    %c0 = arith.constant 0 : index
    %c0_0 = arith.constant 0 : index
    %0 = vector.load %arg1[%c0, %c0_0] : memref<64x128xf32, #tpu.memory_space<vmem>>, vector<64x128xf32>
    %c0_1 = arith.constant 0 : index
    %c0_2 = arith.constant 0 : index
    %1 = vector.load %arg2[%c0_1, %c0_2] : memref<1x128xf32, #tpu.memory_space<vmem>>, vector<1x128xf32>
    %c0_3 = arith.constant 0 : index
    %c0_4 = arith.constant 0 : index
    %2 = vector.load %arg3[%c0_3, %c0_4] : memref<1x128xf32, #tpu.memory_space<vmem>>, vector<1x128xf32>
    %cst = arith.constant dense<0.000000e+00> : vector<64xf32>
    %3 = vector.multi_reduction <add>, %0, %cst [1] : vector<64x128xf32> to vector<64xf32>
    %4 = vector.shape_cast %3 : vector<64xf32> to vector<64x1xf32>
    %cst_5 = arith.constant 7.812500e-03 : f32
    %5 = vector.broadcast %cst_5 : f32 to vector<64x1xf32>
    %6 = arith.mulf %4, %5 : vector<64x1xf32>
    %7 = vector.broadcast %6 : vector<64x1xf32> to vector<64x128xf32>
    %8 = arith.subf %0, %7 : vector<64x128xf32>
    %9 = arith.mulf %8, %8 : vector<64x128xf32>
    %cst_6 = arith.constant dense<0.000000e+00> : vector<64xf32>
    %10 = vector.multi_reduction <add>, %9, %cst_6 [1] : vector<64x128xf32> to vector<64xf32>
    %11 = vector.shape_cast %10 : vector<64xf32> to vector<64x1xf32>
    %cst_7 = arith.constant 7.812500e-03 : f32
    %12 = vector.broadcast %cst_7 : f32 to vector<64x1xf32>
    %13 = arith.mulf %11, %12 : vector<64x1xf32>
    %cst_8 = arith.constant 1.000000e-01 : f32
    %14 = vector.broadcast %cst_8 : f32 to vector<64x1xf32>
    %15 = arith.addf %13, %14 : vector<64x1xf32>
    %16 = math.rsqrt %15 : vector<64x1xf32>
    %17 = vector.broadcast %16 : vector<64x1xf32> to vector<64x128xf32>
    %18 = arith.mulf %8, %17 : vector<64x128xf32>
    %19 = vector.broadcast %1 : vector<1x128xf32> to vector<64x128xf32>
    %20 = arith.mulf %19, %18 : vector<64x128xf32>
    %21 = vector.broadcast %2 : vector<1x128xf32> to vector<64x128xf32>
    %22 = arith.addf %20, %21 : vector<64x128xf32>
    %c0_9 = arith.constant 0 : index
    %c0_10 = arith.constant 0 : index
    %23 = vector.load %arg4[%c0_9, %c0_10] : memref<64x128xf32, #tpu.memory_space<vmem>>, vector<64x128xf32>
    tpu.vector_store %arg4[%c0_9, %c0_10], %22 {strides = array<i32>} : memref<64x128xf32, #tpu.memory_space<vmem>>, vector<64x128xf32>,
    return
  }
  func.func @transform_0(%arg0: i32) -> (i32, i32) {
    %c0_i32 = arith.constant 0 : i32
    %c0_i32_0 = arith.constant 0 : i32
    return %arg0, %c0_i32 : i32, i32
  }
  func.func @transform_1(%arg0: i32) -> (i32, i32) {
    %c0_i32 = arith.constant 0 : i32
    %c0_i32_0 = arith.constant 0 : i32
    %c0_i32_1 = arith.constant 0 : i32
    return %c0_i32, %c0_i32_0 : i32, i32
  }
  func.func @transform_2(%arg0: i32) -> (i32, i32) {
    %c0_i32 = arith.constant 0 : i32
    %c0_i32_0 = arith.constant 0 : i32
    %c0_i32_1 = arith.constant 0 : i32
    return %c0_i32, %c0_i32_0 : i32, i32
  }
  func.func @transform_3(%arg0: i32) -> (i32, i32) {
    %c0_i32 = arith.constant 0 : i32
    %c0_i32_0 = arith.constant 0 : i32
    return %arg0, %c0_i32 : i32, i32
  }
}

</mosaic_0001>

<bundles_post_ra>
// kernel: tpu_custom_call.1
= control target key start
LH: loop header
LB: loop body
LE: loop exit
PB: predicated region body
PF: predicated region fallthrough
CT: control target
= control target key end

     0   :  { %8 = vsyncpa [#allocation3], 0  ;;  %s841_s0 = inlined_call_operand.hbm [shape: f32[256,128], index: 0, kind: input, shape index: {}]   ;;  %s842_s1 = inlined_call_operand.vmem [shape: f32[1,128], index: 1, kind: input, shape index: {}]   ;;  %s843_s2 = inlined_call_operand.vmem [shape: f32[1,128], index: 2, kind: input, shape index: {}]   ;;  %s844_s3 = inlined_call_operand.hbm [shape: f32[256,128], index: 3, kind: output, shape index: {}]  }
   0x1   :  { %10 = vsyncpa [#allocation3 + $0x1], 0 }
   0x2   :  { %11 = vsyncpa [#allocation4], 0 }
   0x3   :  { %13 = vsyncpa [#allocation4 + $0x1], 0  ;;  %s620_s12 = smov 0   ;;  %s622_s13 = smov 0  }
   0x4   :  { %s624_s14 = smov 0   ;;  %s626_s15 = smov 0  }
   0x5 LB: > { %s641_s16 = sadd.s32 4294967295, %s592_s15   ;;  %s412_s17 = sadd.s32 4294967294, %s592_s15   ;;  %s592_s15 = sphi %s626_s15, %s856_s15   ;;  %s588_s14 = sphi %s624_s14, %s855_s14   ;;  %s584_s13 = sphi %s622_s13, %s854_s13   ;;  %s580_s12 = sphi %s620_s12, %s853_s12  }
   0x6   : > { %s645_s18 = sadd.s32 1, %s592_s15   ;;  %s26_s19 = sadd.s32 1, %s588_s14 }
   0x7   : > { %s23_s20 = ssub.s32 %s592_s15, %s645_s18  ;;  %p33_p0 = scmp.ne.s32.totalorder %s588_s14, %s584_s13 }
   0x8   : > { %p24_p1 = scmp.eq.s32.totalorder %s23_s20, 0  ;;  %p34_p2 = scmp.eq.s32.totalorder %s592_s15, 0 }
   0x9   : > { %p39_p3 = scmp.ne.s32.totalorder %s584_s13, %s580_s12  ;;  %p40_p4 = scmp.eq.s32.totalorder %s641_s16, 0 }
   0xa   : > { %s657_s21 = scalar_select %p24_p1, %s588_s14, %s26_s19  }
   0xb   : > { %p659_p5 = por %p34_p2, %p33_p0  ;;  %p663_p6 = por %p40_p4, %p39_p3 }
   0xc   : > { %p105_p7 = scmp.eq.s32.totalorder %s641_s16, 3  ;;  %p111_p8 = scmp.eq.s32.totalorder %s412_s17, 3 }
   0xd   : > { %p442_p9 = scmp.lt.s32.totalorder %s592_s15, 4  ;;  %s137_s26 = sand.u32 1, %s588_s14  }
   0xe   : > { %p669_p10 = por %p105_p7, %p33_p0  ;;  %p673_p11 = por %p111_p8, %p39_p3 }
   0xf   : > { %s428_s27 = sshll.u32 %s592_s15, 10  ;;  %s415_s28 = sshll.u32 %s137_s26, 6 }
  0x10   : > { %s848_s24 = scalar_select %p669_p10, 1, 0 }
  0x11   : > { %s849_s25 = scalar_select %p673_p11, 1, 0 }
  0x12   : > { %s682_s4 = scalar_lea.hbm %s841_s0, %s428_s27  ;;  %s141_s5 = scalar_lea.vmem [#allocation2], %s415_s28 }
  0x13   : > { %s148_s6 = sshll.u32 %s141_s5, 4  ;;  %p686_p12 = pnand %p442_p9, %p659_p5  ;;  %s690_s6 = int_to_ptr.vmem [resolvable:$true] %s148_s6 }
  0x14   : > { %s692_s8 = scalar_lea.sflag [#allocation3], %s137_s26  ;;  %s496_s9 = scalar_lea.hbm %s682_s4, 1024 }
  0x15   : > { %p497_p13 = scmp.ne.s32.totalorder %s682_s4, %s496_s9  ;;  %p498_p0 = pneg %p686_p12 }
  0x16   : > { %s501_s17 = scalar_lea.hbm %s841_s0, 4096  ;;  %p502_p3 = scmp.lt.u32.totalorder %s682_s4, %s841_s0 }
  0x17   : > { %p499_p1 = pnand %p498_p0, %p497_p13  ;;  %p503_p4 = scmp.lt.u32.totalorder %s501_s17, %s496_s9 }
  0x18   : > { %p505_p7 = scmp.lt.u32.totalorder %s496_s9, %s682_s4 }
  0x19   : > { %p500_p2 = pneg %p499_p1  ;;  %p504_p5 = por %p503_p4, %p502_p3 }
  0x1b   : > { %p506_p8 = por %p505_p7, %p504_p5 }
  0x1d   : > { %p507_p9 = pnand %p506_p8, %p500_p2 }
  0x1f   : > { %510 = shalt.err (!%p507_p9)
}
  0x20   : > { %s511_s22 = scalar_lea.vmem %s690_s6, 1024  ;;  %s594_s26 = smov [#allocation2]  }
  0x21   : > { %p512_p13 = scmp.ne.s32.totalorder %s690_s6, %s511_s22  ;;  %s516_s27 = sshll.u32 %s594_s26, 4  ;;  %s517_s27 = int_to_ptr.vmem [resolvable:$false] %s516_s27 }
  0x22   : > { %s518_s28 = scalar_lea.vmem %s517_s27, 2048  ;;  %p519_p10 = scmp.lt.s32.totalorder %s690_s6, %s517_s27 }
  0x23   : > { %p514_p1 = pnand %p512_p13, %p498_p0  ;;  %p520_p3 = scmp.lt.s32.totalorder %s518_s28, %s511_s22 }
  0x25   : > { %p515_p11 = pneg %p514_p1  ;;  %p521_p4 = por %p520_p3, %p519_p10 }
  0x27   : > { %p522_p5 = pnand %p521_p4, %p515_p11 }
  0x29   : > { %525 = shalt.err (!%p522_p5)
}
  0x2a   : > { %s595_s29 = smov 128   ;;  %s596_s30 = smov 8  }
  0x2b   : > { %437 = dma.hbm_to_vmem [thread:$0]  (!%p686_p12), %s682_s4, 1024, %s690_s6, %s692_s8, %s595_s29, %s595_s29, %s596_s30  }
  0x2c   : > { %p418_p0 = scmp.ge.s32.totalorder %s592_s15, 1  ;;  %p156_p2 = scmp.lt.s32.totalorder %s592_s15, 5 }
  0x2e   : > { %p157_p7 = pnand %p418_p0, %p156_p2 }
  0x2f   : > { %s723_s5 = sand.u32 (!%p157_p7), 1, %s584_s13  }
  0x30   : > { %160 = sbr.rel (%p157_p7) target bundleno = 399 (0x18f), region = 32  ;;  %s419_s9 = sshll.u32 (!%p157_p7), %s723_s5, 6 }
  0x31   : > { %s163_s10 = scalar_lea.sflag (!%p157_p7), [#allocation3], %s723_s5  ;;  %s166_s11 = scalar_lea.vmem (!%p157_p7), [#allocation2], %s419_s9 }
  0x37   : > { %571 = dma.done.wait (%p663_p6), %s163_s10, 1024  }
  0x38   : > { %573 = vsyncadd (%p663_p6), %s163_s10, 4294966272  ;;  %v191_v0 = vld [vmem:[%s166_s11] sm:$0xff]  ;;  %v193_v1 = vld [vmem:[%s166_s11 + $0x10] sm:$0xff]  ;;  %s776_s8 = scalar_lea.vmem [#allocation5], %s419_s9  ;;  %s429_s17 = sshll.u32 %s641_s16, 10 }
  0x39   : > { %201 = vadd.xlane.f32.xlu0 %v191_v0  ;;  %205 = vadd.xlane.f32.xlu1 %v193_v1  ;;  %v192_v2 = vld [vmem:[%s166_s11 + $0x8] sm:$0xff]  ;;  %v194_v3 = vld [vmem:[%s166_s11 + $0x18] sm:$0xff]  ;;  %v195_v4 = vld [vmem:[%s166_s11 + $0x20] sm:$0xff]  ;;  %s339_s19 = sshll.u32 %s776_s8, 4  ;;  %s795_s26 = scalar_lea.hbm %s844_s3, %s429_s17  ;;  %s797_s19 = int_to_ptr.vmem [resolvable:$true] %s339_s19 }
  0x3a   : > { %v196_v5 = vld [vmem:[%s166_s11 + $0x28] sm:$0xff]  ;;  %v197_v6 = vld [vmem:[%s166_s11 + $0x30] sm:$0xff]  ;;  %v198_v7 = vld [vmem:[%s166_s11 + $0x38] sm:$0xff]  ;;  %s326_s27 = scalar_lea.sflag [#allocation4], %s723_s5  ;;  %s526_s28 = scalar_lea.vmem %s797_s19, 1024 }
  0x3b   : > { %v421_v60 = vld [vmem:[%s842_s1] ss:$0 sm:$0xff]  ;;  %p527_p6 = scmp.ne.s32.totalorder %s797_s19, %s526_s28  ;;  %p851_p10 = scmp.ne.s32.totalorder %s848_s24, 0 }
  0x3c   : > { %s597_s16 = smov [#allocation5]  }
  0x3d   : > { %203 = vadd.xlane.f32.xlu0 %v192_v2  ;;  %207 = vadd.xlane.f32.xlu1 %v194_v3  ;;  %p528_p11 = pnand %p527_p6, %p851_p10  ;;  %s530_s29 = sshll.u32 %s597_s16, 4  ;;  %s531_s29 = int_to_ptr.vmem [resolvable:$false] %s530_s29 }
  0x3e   : > { %s532_s30 = scalar_lea.vmem %s531_s29, 2048  ;;  %p533_p8 = scmp.lt.s32.totalorder %s797_s19, %s531_s29 }
  0x3f   : > { %p529_p12 = pneg %p528_p11  ;;  %p534_p9 = scmp.lt.s32.totalorder %s532_s30, %s526_s28 }
  0x41   : > { %209 = vadd.xlane.f32.xlu0 %v195_v4  ;;  %211 = vadd.xlane.f32.xlu1 %v196_v5  ;;  %p535_p13 = por %p534_p9, %p533_p8 }
  0x43   : > { %p536_p1 = pnand %p535_p13, %p529_p12 }
  0x45   : > { %213 = vadd.xlane.f32.xlu0 %v197_v6  ;;  %215 = vadd.xlane.f32.xlu1 %v198_v7 }
  0xc6   : > { %v202_v8 = vpop.xlane.xlu0 %201  ;;  %v206_v9 = vpop.xlane.xlu1 %205 }
  0xc7   : > { %v217_v10 = vmul.f32 0.0078125, %v202_v8  ;;  %v219_v11 = vmul.f32 0.0078125, %v206_v9 }
  0xc9   : > { %v733_v12 = vsub.f32 %v191_v0, %v217_v10  ;;  %v735_v13 = vsub.f32 %v193_v1, %v219_v11  ;;  %v422_v1 = vld [vmem:[%s843_s2] ss:$0 sm:$0xff] }
  0xca   : > { %v204_v14 = vpop.xlane.xlu0 %203  ;;  %v208_v15 = vpop.xlane.xlu1 %207 }
  0xcb   : > { %v218_v16 = vmul.f32 0.0078125, %v204_v14  ;;  %v233_v17 = vmul.f32 %v733_v12, %v733_v12  ;;  %v220_v18 = vmul.f32 0.0078125, %v208_v15  ;;  %v235_v21 = vmul.f32 %v735_v13, %v735_v13 }
  0xcd   : > { %v739_v19 = vsub.f32 %v192_v2, %v218_v16  ;;  %241 = vadd.xlane.f32.xlu0 %v233_v17  ;;  %v741_v20 = vsub.f32 %v194_v3, %v220_v18 }
  0xce   : > { %v210_v22 = vpop.xlane.xlu0 %209  ;;  %v212_v23 = vpop.xlane.xlu1 %211 }
  0xcf   : > { %v221_v24 = vmul.f32 0.0078125, %v210_v22  ;;  %v234_v25 = vmul.f32 %v739_v19, %v739_v19  ;;  %v222_v26 = vmul.f32 0.0078125, %v212_v23  ;;  %v236_v29 = vmul.f32 %v741_v20, %v741_v20 }
  0xd1   : > { %v747_v27 = vsub.f32 %v195_v4, %v221_v24  ;;  %245 = vadd.xlane.f32.xlu0 %v235_v21  ;;  %243 = vadd.xlane.f32.xlu1 %v234_v25  ;;  %v749_v28 = vsub.f32 %v196_v5, %v222_v26 }
  0xd2   : > { %v214_v30 = vpop.xlane.xlu0 %213  ;;  %v216_v31 = vpop.xlane.xlu1 %215 }
  0xd3   : > { %v223_v32 = vmul.f32 0.0078125, %v214_v30  ;;  %v237_v33 = vmul.f32 %v747_v27, %v747_v27  ;;  %v224_v34 = vmul.f32 0.0078125, %v216_v31  ;;  %v238_v37 = vmul.f32 %v749_v28, %v749_v28 }
  0xd5   : > { %v755_v35 = vsub.f32 %v197_v6, %v223_v32  ;;  %247 = vadd.xlane.f32.xlu1 %v236_v29  ;;  %249 = vadd.xlane.f32.xlu0 %v237_v33  ;;  %v757_v36 = vsub.f32 %v198_v7, %v224_v34 }
  0xd7   : > { %v239_v38 = vmul.f32 %v755_v35, %v755_v35  ;;  %v240_v39 = vmul.f32 %v757_v36, %v757_v36 }
  0xd9   : > { %251 = vadd.xlane.f32.xlu1 %v238_v37  ;;  %253 = vadd.xlane.f32.xlu0 %v239_v38 }
  0xdd   : > { %255 = vadd.xlane.f32.xlu1 %v240_v39 }
 0x15a   : > { %v242_v40 = vpop.xlane.xlu0 %241 }
 0x15b   : > { %v257_v41 = vmul.f32 0.0078125, %v242_v40 }
 0x15d   : > { %v265_v42 = vadd.f32 0.1, %v257_v41 }
 0x15e   : > { %v244_v43 = vpop.xlane.xlu1 %243  ;;  %v246_v44 = vpop.xlane.xlu0 %245 }
 0x15f   : > { %480 = vrsqrt.f32 %v265_v42  ;;  %v258_v45 = vmul.f32 0.0078125, %v244_v43  ;;  %v259_v46 = vmul.f32 0.0078125, %v246_v44 }
 0x161   : > { %v266_v47 = vadd.f32 0.1, %v258_v45  ;;  %v267_v48 = vadd.f32 0.1, %v259_v46 }
 0x162   : > { %v248_v49 = vpop.xlane.xlu1 %247  ;;  %v250_v50 = vpop.xlane.xlu0 %249 }
 0x163   : > { %482 = vrsqrt.f32 %v266_v47  ;;  %v260_v51 = vmul.f32 0.0078125, %v248_v49  ;;  %v261_v52 = vmul.f32 0.0078125, %v250_v50 }
 0x164   : > { %484 = vrsqrt.f32 %v267_v48 }
 0x165   : > { %v268_v53 = vadd.f32 0.1, %v260_v51  ;;  %v269_v54 = vadd.f32 0.1, %v261_v52 }
 0x166   : > { %v252_v55 = vpop.xlane.xlu1 %251  ;;  %v254_v56 = vpop.xlane.xlu0 %253 }
 0x167   : > { %486 = vrsqrt.f32 %v268_v53  ;;  %v262_v57 = vmul.f32 0.0078125, %v252_v55  ;;  %v263_v58 = vmul.f32 0.0078125, %v254_v56 }
 0x168   : > { %488 = vrsqrt.f32 %v269_v54 }
 0x169   : > { %v481_v59 = vpop.eup %480  ;;  %v270_v61 = vadd.f32 0.1, %v262_v57  ;;  %v271_v62 = vadd.f32 0.1, %v263_v58 }
 0x16a   : > { %v281_v63 = vmul.f32 %v481_v59, %v733_v12  ;;  %v256_v0 = vpop.xlane.xlu1 %255 }
 0x16b   : > { %490 = vrsqrt.f32 %v270_v61  ;;  %v264_v2 = vmul.f32 0.0078125, %v256_v0 }
 0x16c   : > { %v295_v3 = vmul.f32 %v421_v60, %v281_v63  ;;  %492 = vrsqrt.f32 %v271_v62 }
 0x16d   : > { %v483_v4 = vpop.eup %482  ;;  %v272_v5 = vadd.f32 0.1, %v264_v2 }
 0x16e   : > { %v485_v6 = vpop.eup %484  ;;  %v309_v7 = vadd.f32 %v422_v1, %v295_v3  ;;  %v282_v8 = vmul.f32 %v483_v4, %v739_v19 }
 0x16f   : > { %v283_v9 = vmul.f32 %v485_v6, %v735_v13  ;;  %494 = vrsqrt.f32 %v272_v5 }
 0x170   : > { %317 = vst [vmem:[%s776_s8] sm:$0xff] %v309_v7  ;;  %v296_v10 = vmul.f32 %v421_v60, %v282_v8 }
 0x171   : > { %v487_v11 = vpop.eup %486  ;;  %v297_v12 = vmul.f32 %v421_v60, %v283_v9 }
 0x172   : > { %v489_v14 = vpop.eup %488  ;;  %v310_v15 = vadd.f32 %v422_v1, %v296_v10  ;;  %v284_v16 = vmul.f32 %v487_v11, %v741_v20 }
 0x173   : > { %v311_v17 = vadd.f32 %v422_v1, %v297_v12  ;;  %v285_v13 = vmul.f32 %v489_v14, %v747_v27 }
 0x174   : > { %318 = vst [vmem:[%s776_s8 + $0x8] sm:$0xff] %v310_v15  ;;  %v298_v18 = vmul.f32 %v421_v60, %v284_v16 }
 0x175   : > { %v491_v19 = vpop.eup %490  ;;  %319 = vst [vmem:[%s776_s8 + $0x10] sm:$0xff] %v311_v17  ;;  %v299_v21 = vmul.f32 %v421_v60, %v285_v13 }
 0x176   : > { %v493_v22 = vpop.eup %492  ;;  %v312_v23 = vadd.f32 %v422_v1, %v298_v18  ;;  %v286_v24 = vmul.f32 %v491_v19, %v749_v28 }
 0x177   : > { %v313_v25 = vadd.f32 %v422_v1, %v299_v21  ;;  %v287_v20 = vmul.f32 %v493_v22, %v755_v35 }
 0x178   : > { %320 = vst [vmem:[%s776_s8 + $0x18] sm:$0xff] %v312_v23  ;;  %v300_v26 = vmul.f32 %v421_v60, %v286_v24 }
 0x179   : > { %v495_v27 = vpop.eup %494  ;;  %321 = vst [vmem:[%s776_s8 + $0x20] sm:$0xff] %v313_v25  ;;  %v301_v29 = vmul.f32 %v421_v60, %v287_v20 }
 0x17a   : > { %v314_v30 = vadd.f32 %v422_v1, %v300_v26  ;;  %v288_v31 = vmul.f32 %v495_v27, %v757_v36 }
 0x17b   : > { %v315_v32 = vadd.f32 %v422_v1, %v301_v29 }
 0x17c   : > { %322 = vst [vmem:[%s776_s8 + $0x28] sm:$0xff] %v314_v30  ;;  %v302_v33 = vmul.f32 %v421_v60, %v288_v31 }
 0x17d   : > { %323 = vst [vmem:[%s776_s8 + $0x30] sm:$0xff] %v315_v32 }
 0x17e   : > { %v316_v28 = vadd.f32 %v422_v1, %v302_v33 }
 0x180   : > { %324 = vst [vmem:[%s776_s8 + $0x38] sm:$0xff] %v316_v28 }
 0x181   : > { %539 = shalt.err (!%p536_p1)
}
 0x182   : > { %s540_s9 = scalar_lea.hbm %s795_s26, 1024  ;;  %s544_s23 = scalar_lea.hbm %s844_s3, 4096 }
 0x183   : > { %p541_p3 = scmp.ne.s32.totalorder %s795_s26, %s540_s9  ;;  %p545_p0 = scmp.lt.u32.totalorder %s795_s26, %s844_s3 }
 0x184   : > { %p546_p2 = scmp.lt.u32.totalorder %s544_s23, %s540_s9  ;;  %p548_p6 = scmp.lt.u32.totalorder %s540_s9, %s795_s26 }
 0x185   : > { %p542_p4 = pnand %p541_p3, %p851_p10 }
 0x186   : > { %p547_p7 = por %p546_p2, %p545_p0 }
 0x187   : > { %p543_p5 = pneg %p542_p4 }
 0x188   : > { %p549_p11 = por %p548_p6, %p547_p7 }
 0x18a   : > { %p550_p12 = pnand %p549_p11, %p543_p5 }
 0x18c   : > { %553 = shalt.err (!%p550_p12)
}
 0x18d   : > { %s598_s7 = smov 128   ;;  %s599_s8 = smov 8  }
 0x18e   : > { %432 = dma.vmem_to_hbm [thread:$0]  (%p851_p10), %s797_s19, 1024, %s795_s26, %s326_s27, %s598_s7, %s598_s7, %s599_s8  }
 0x18f PF: > { %p443_p8 = scmp.ge.s32.totalorder %s592_s15, 2  ;;  %s354_s17 = sand.u32 1, %s580_s12  }
 0x190   : > { %p852_p9 = scmp.ne.s32.totalorder %s849_s25, 0  ;;  %s355_s20 = scalar_lea.sflag [#allocation4], %s354_s17 }
 0x192   : > { %p439_p13 = pnand %p443_p8, %p852_p9 }
 0x194   : > { %575 = dma.done.wait (!%p439_p13), %s355_s20, 1024  }
 0x195   : > { %577 = vsyncadd (!%p439_p13), %s355_s20, 4294966272  ;;  %p16_p1 = scmp.ge.s32.totalorder %s645_s18, 6   ;;  %s853_s12 = smov %s584_s13 }
 0x196   : > { %s854_s13 = smov %s588_s14  ;;  %s855_s14 = smov %s657_s21 }
 0x197   : > { %s856_s15 = smov %s645_s18  ;;  %18 = sbr.rel (!%p16_p1) target bundleno = 5 (0x5), region = 77 }
 0x19e   :  { %360 = vsyncpa [#allocation3], 1 }
 0x19f   :  { %362 = vsyncpa [#allocation3 + $0x1], 1 }
 0x1a0   :  { %363 = vsyncpa [#allocation4], 1 }
 0x1a1   :  { %365 = vsyncpa [#allocation4 + $0x1], 1 }

</bundles_post_ra>
